<compile_context>
chip_gen: v7x
topology: tpu7x:2x2x1
jax: 0.10.0
libtpu: 0.0.40
codegen_flags: <defaults>
</compile_context>

<pallas_src>
import functools
import math

import jax
import jax.numpy as jnp
from jax.experimental import pallas as pl
from jax.experimental.pallas import tpu as pltpu


def _cdiv(a, b):
    return -(-a // b)


def _vmem_capacity_bytes():
    try:
        info = pltpu.get_tpu_info()
        cap = getattr(info, "vmem_capacity_bytes", None)
        if cap:
            return int(cap)
    except Exception:
        pass
    return 64 << 20  # conservative fallback (v7x per-TC VMEM)


def _pick_tile_and_vmem(rows, dim, itemsize, n_stream):
    """Row tile + scoped-vmem limit for a rows x dim per-row kernel.

    n_stream = number of (br, dim) arrays streamed through VMEM per grid step
    (inputs + outputs), each double-buffered by the BlockSpec pipeline.
    """
    vmem_cap = _vmem_capacity_bytes()
    if vmem_cap >= (128 << 20):          # v5e / v6e: 128 MiB VMEM
        target_buf_bytes = 12 << 20
        cap_limit = 100 << 20
    else:                                # v7x: 64 MiB VMEM per TC
        target_buf_bytes = 7 << 20
        cap_limit = 54 << 20

    # sublane alignment of the packed dtype: 8 f32, 16 bf16/f16, 32 int8/fp8
    sublane = max(8, 32 // max(itemsize, 1))

    # rows per step from a per-buffer byte target, in the *input* dtype
    br = max(sublane, target_buf_bytes // max(dim * itemsize, 1))
    # keep the whole working set (double-buffered streams + ~2 f32 temps) under cap
    per_row = dim * (2 * n_stream * itemsize + 2 * 4)
    br = min(br, max(sublane, (cap_limit - (8 << 20)) // per_row))
    br = max(sublane, (br // sublane) * sublane)

    if rows <= sublane:
        br = rows                        # single full-extent block (always legal)
    else:
        # force >= 2 blocks so the "parallel" axis can split across v7x's 2 TCs
        br = min(br, max(sublane, ((rows - 1) // sublane) * sublane))
        nblk = _cdiv(rows, br)
        if nblk > 1 and nblk % 2 == 1:
            # best-effort: prefer an even block count for 2-core balance
            cand = _cdiv(_cdiv(rows, nblk + 1), sublane) * sublane
            if cand >= sublane and _cdiv(rows, cand) % 2 == 0:
                br = cand

    est = (2 * n_stream * br * dim * itemsize    # double-buffered streaming tiles
           + 2 * br * dim * 4                    # f32 temps inside the kernel body
           + 4 * dim * 4                         # resident weight rows
           + (6 << 20))                          # headroom
    vmem_limit = int(min(cap_limit, max(32 << 20, est)))
    return br, vmem_limit


def _fused_rmsnorm_kernel(*refs, eps, inv_dim, has_residual, num_norms,
                          emit_residual):
    # ref order: x, [delta], w_0..w_{num_norms-1}, then outputs
    #            ([h], y_0, ..., y_{num_norms-1})
    i = 0
    x_ref = refs[i]; i += 1
    d_ref = None
    if has_residual:
        d_ref = refs[i]; i += 1
    w_refs = refs[i:i + num_norms]; i += num_norms
    out_refs = refs[i:]

    x = x_ref[...]
    if has_residual:
        x = x + d_ref[...]                       # residual add, streaming dtype
    o = 0
    if emit_residual:
        out_refs[o][...] = x.astype(out_refs[o].dtype)
        o += 1
    y = x.astype(jnp.float32)
    for n in range(num_norms):
        # sum-of-squares (XLU) * 1/dim (one VALU mul), rsqrt on the EUP
        ms = jnp.sum(y * y, axis=-1, keepdims=True) * inv_dim
        inv = jax.lax.rsqrt(ms + eps)
        y = y * inv * w_refs[n][...].astype(jnp.float32)   # (1, dim) broadcasts
        out_refs[o][...] = y.astype(out_refs[o].dtype)
        o += 1


def _fused_rmsnorm(x, delta, weights, eps, emit_residual):
    orig_shape = x.shape
    dim = orig_shape[-1]
    rows = math.prod(orig_shape[:-1]) if len(orig_shape) > 1 else 1
    itemsize = jnp.dtype(x.dtype).itemsize

    ins = [x.reshape(rows, dim)]
    n_stream_in = 1
    if delta is not None:
        ins.append(delta.reshape(rows, dim))
        n_stream_in += 1
    for w in weights:
        ins.append(w.reshape(1, dim))

    num_out = (1 if emit_residual else 0) + len(weights)
    n_stream = n_stream_in + num_out
    br, vmem_limit = _pick_tile_and_vmem(rows, dim, itemsize, n_stream)
    grid = (_cdiv(rows, br),)            # ragged last block is per-row safe

    row_spec = pl.BlockSpec((br, dim), lambda i: (i, 0))
    w_spec = pl.BlockSpec((1, dim), lambda i: (0, 0))   # resident, DMA'd once
    in_specs = [row_spec] * n_stream_in + [w_spec] * len(weights)
    out_specs = [row_spec] * num_out
    out_shape = tuple(jax.ShapeDtypeStruct((rows, dim), x.dtype)
                      for _ in range(num_out))

    kernel = functools.partial(
        _fused_rmsnorm_kernel, eps=eps, inv_dim=1.0 / dim,
        has_residual=delta is not None, num_norms=len(weights),
        emit_residual=emit_residual)

    outs = pl.pallas_call(
        kernel,
        out_shape=out_shape,
        grid_spec=pltpu.PrefetchScalarGridSpec(
            num_scalar_prefetch=0,
            grid=grid,
            in_specs=in_specs,
            out_specs=out_specs,
        ),
        compiler_params=pltpu.CompilerParams(
            dimension_semantics=("parallel",),
            vmem_limit_bytes=vmem_limit,
        ),
    )(*ins)
    if not isinstance(outs, (tuple, list)):
        outs = (outs,)
    return tuple(o.reshape(orig_shape) for o in outs)


# ----------------------------------------------------------------------------
# Public fused-norm entry points
# ----------------------------------------------------------------------------
def rmsnorm(x, weight, eps=1e-6):
    """y = x * rsqrt(mean(x^2, -1) + eps) * weight (Pallas kernel)."""
    return _fused_rmsnorm(x, None, (weight,), eps, emit_residual=False)[0]


def add_rmsnorm(x, delta, weight, eps=1e-6):
    """h = x + delta; returns (h, rmsnorm(h) * weight) in one HBM pass."""
    return _fused_rmsnorm(x, delta, (weight,), eps, emit_residual=True)


def add_rmsnorm_only(x, delta, weight, eps=1e-6):
    """h = x + delta; returns rmsnorm(h) * weight (h itself is not written)."""
    return _fused_rmsnorm(x, delta, (weight,), eps, emit_residual=False)[0]


def add_double_rmsnorm(x, delta, w1, w2, eps=1e-6):
    """h = x + delta; y1 = rmsnorm(h)*w1; y2 = rmsnorm(y1)*w2; returns (y1, y2)."""
    return _fused_rmsnorm(x, delta, (w1, w2), eps, emit_residual=False)


def rmsnorm_ref(x, weight, eps=1e-6):
    return x * jax.lax.rsqrt(jnp.mean(x * x, axis=-1, keepdims=True) + eps) * weight


# ----------------------------------------------------------------------------
# LlamaOld forward (matches the PyTorch reference: full-dim single-head
# attention, no mask, exact gelu, and the shared final norm applied after
# every layer).  The Pallas path fuses the residual adds and the back-to-back
# layer-boundary norms; the reference path is purely sequential JAX.
# ----------------------------------------------------------------------------
def llama_forward_pallas(params, tokens, dim, eps):
    h = params["tok_emb"][tokens]                      # (B, S, dim)
    scale = 1.0 / (dim ** 0.5)
    layers = params["layers"]
    n_layers = len(layers)

    # attention input for layer 0: plain norm of the embeddings
    xn = rmsnorm(h, layers[0]["attn_norm_w"], eps)
    for li, lp in enumerate(layers):
        # attention block
        q = xn @ lp["wq"].T
        k = xn @ lp["wk"].T
        v = xn @ lp["wv"].T
        scores = jnp.einsum("bqd,bkd->bqk", q, k) * scale
        attn = jax.nn.softmax(scores, axis=-1)
        ctx = jnp.einsum("bqk,bkd->bqd", attn, v)
        attn_out = ctx @ lp["wo"].T
        # fused: h = h + attn_out ; hn = rmsnorm(h) * ffn_norm_w
        h, hn = add_rmsnorm(h, attn_out, lp["ffn_norm_w"], eps)
        # feed-forward block
        ff = jax.nn.gelu(hn @ lp["fc1_w"].T + lp["fc1_b"], approximate=False)
        ff_out = ff @ lp["fc2_w"].T + lp["fc2_b"]
        if li + 1 < n_layers:
            # fused layer boundary: h2 = h + ff_out ;
            # h   = rmsnorm(h2) * final_norm_w          (new residual stream)
            # xn  = rmsnorm(h)  * next layer attn_norm  (next attention input)
            h, xn = add_double_rmsnorm(h, ff_out, params["final_norm_w"],
                                       layers[li + 1]["attn_norm_w"], eps)
        else:
            h = add_rmsnorm_only(h, ff_out, params["final_norm_w"], eps)
    return h @ params["out_w"].T


def llama_forward_ref(params, tokens, dim, eps):
    h = params["tok_emb"][tokens]
    scale = 1.0 / (dim ** 0.5)
    for lp in params["layers"]:
        xn = rmsnorm_ref(h, lp["attn_norm_w"], eps)
        q = xn @ lp["wq"].T
        k = xn @ lp["wk"].T
        v = xn @ lp["wv"].T
        scores = jnp.einsum("bqd,bkd->bqk", q, k) * scale
        attn = jax.nn.softmax(scores, axis=-1)
        ctx = jnp.einsum("bqk,bkd->bqd", attn, v)
        h = h + ctx @ lp["wo"].T
        hn = rmsnorm_ref(h, lp["ffn_norm_w"], eps)
        ff = jax.nn.gelu(hn @ lp["fc1_w"].T + lp["fc1_b"], approximate=False)
        h = h + ff @ lp["fc2_w"].T + lp["fc2_b"]
        h = rmsnorm_ref(h, params["final_norm_w"], eps)
    return h @ params["out_w"].T


def init_params(key, vocab, dim, n_layers):
    def dense(k, shape, scale=0.02):
        return scale * jax.random.normal(k, shape, dtype=jnp.float32)

    keys = jax.random.split(key, 3 + n_layers)
    params = {
        "tok_emb": jax.random.normal(keys[0], (vocab, dim), dtype=jnp.float32),
        "out_w": dense(keys[1], (vocab, dim)),
        "final_norm_w": 1.0 + 0.05 * jax.random.normal(keys[2], (dim,), jnp.float32),
        "layers": [],
    }
    for l in range(n_layers):
        lk = jax.random.split(keys[3 + l], 10)
        params["layers"].append({
            "attn_norm_w": 1.0 + 0.05 * jax.random.normal(lk[8], (dim,), jnp.float32),
            "ffn_norm_w": 1.0 + 0.05 * jax.random.normal(lk[9], (dim,), jnp.float32),
            "wq": dense(lk[0], (dim, dim)),
            "wk": dense(lk[1], (dim, dim)),
            "wv": dense(lk[2], (dim, dim)),
            "wo": dense(lk[3], (dim, dim)),
            "fc1_w": dense(lk[4], (4 * dim, dim)),
            "fc1_b": dense(lk[5], (4 * dim,)),
            "fc2_w": dense(lk[6], (dim, 4 * dim)),
            "fc2_b": dense(lk[7], (dim,)),
        })
    return params


if __name__ == "__main__":
    key = jax.random.PRNGKey(0)
    k_tok, k_par, k_x, k_d, k_w1, k_w2 = jax.random.split(key, 6)

    vocab, dim, n_layers = 64, 32, 2
    batch, seq = 2, 8
    eps = 1e-6

    # 1) plain RMSNorm kernel vs reference
    x = jax.random.normal(k_x, (batch, seq, dim), dtype=jnp.float32)
    w1 = 1.0 + 0.1 * jax.random.normal(k_w1, (dim,), dtype=jnp.float32)
    got = jax.block_until_ready(rmsnorm(x, w1, eps))
    ref = rmsnorm_ref(x, w1, eps)
    assert got.shape == x.shape
    assert jnp.allclose(got, ref, atol=1e-5, rtol=1e-5), "rmsnorm mismatch"

    # 2) fused residual-add + norm
    d = jax.random.normal(k_d, (batch, seq, dim), dtype=jnp.float32)
    w2 = 1.0 + 0.1 * jax.random.normal(k_w2, (dim,), dtype=jnp.float32)
    got_h, got_y = add_rmsnorm(x, d, w1, eps)
    jax.block_until_ready(got_y)
    ref_h = x + d
    assert jnp.allclose(got_h, ref_h, atol=1e-5, rtol=1e-5), "fused add mismatch"
    assert jnp.allclose(got_y, rmsnorm_ref(ref_h, w1, eps),
                        atol=1e-5, rtol=1e-5), "fused add+norm mismatch"

    # 3) fused residual-add + back-to-back norms (layer boundary)
    got_y1, got_y2 = add_double_rmsnorm(x, d, w1, w2, eps)
    jax.block_until_ready(got_y2)
    ref_y1 = rmsnorm_ref(ref_h, w1, eps)
    ref_y2 = rmsnorm_ref(ref_y1, w2, eps)
    assert jnp.allclose(got_y1, ref_y1, atol=1e-5, rtol=1e-5), "double norm y1 mismatch"
    assert jnp.allclose(got_y2, ref_y2, atol=1e-5, rtol=1e-5), "double norm y2 mismatch"

    # 4) full LlamaOld forward with the Pallas kernels at every norm site
    tokens = jax.random.randint(k_tok, (batch, seq), 0, vocab)
    params = init_params(k_par, vocab, dim, n_layers)
    logits = jax.block_until_ready(llama_forward_pallas(params, tokens, dim, eps))
    logits_ref = llama_forward_ref(params, tokens, dim, eps)
    assert logits.shape == (batch, seq, vocab)
    assert jnp.allclose(logits, logits_ref, atol=1e-4, rtol=1e-4), "llama fwd mismatch"

    print("KERNEL_OK")
</pallas_src>

<mosaic_0001>
module attributes {stable_mosaic.version = 11 : i64} {
  func.func @_fused_rmsnorm_kernel(%arg0: i32, %arg1: memref<8x32xf32, #tpu.memory_space<vmem>>, %arg2: memref<1x32xf32, #tpu.memory_space<vmem>>, %arg3: memref<8x32xf32, #tpu.memory_space<vmem>>) attributes {dimension_semantics = [#tpu.dimension_semantics<parallel>], iteration_bounds = array<i64: 2>, scalar_prefetch = 0 : i64, scratch_operands = 0 : i64, tpu.core_type = #tpu.core_type<tc>, window_params = [{transform_indices = @transform_0, window_bounds = array<i64: 8, 32>}, {pipeline_mode = #tpu.pipeline_mode<synchronous>, transform_indices = @transform_1, window_bounds = array<i64: 1, 32>}, {transform_indices = @transform_2, window_bounds = array<i64: 8, 32>}]} {
    %c0 = arith.constant 0 : index
    %c0_0 = arith.constant 0 : index
    %0 = vector.load %arg1[%c0, %c0_0] : memref<8x32xf32, #tpu.memory_space<vmem>>, vector<8x32xf32>
    %1 = arith.mulf %0, %0 : vector<8x32xf32>
    %cst = arith.constant dense<0.000000e+00> : vector<8xf32>
    %2 = vector.multi_reduction <add>, %1, %cst [1] : vector<8x32xf32> to vector<8xf32>
    %3 = vector.shape_cast %2 : vector<8xf32> to vector<8x1xf32>
    %cst_1 = arith.constant 3.125000e-02 : f32
    %4 = vector.broadcast %cst_1 : f32 to vector<8x1xf32>
    %5 = arith.mulf %3, %4 : vector<8x1xf32>
    %cst_2 = arith.constant 9.99999997E-7 : f32
    %6 = vector.broadcast %cst_2 : f32 to vector<8x1xf32>
    %7 = arith.addf %5, %6 : vector<8x1xf32>
    %8 = math.rsqrt %7 : vector<8x1xf32>
    %9 = vector.broadcast %8 : vector<8x1xf32> to vector<8x32xf32>
    %10 = arith.mulf %0, %9 : vector<8x32xf32>
    %c0_3 = arith.constant 0 : index
    %c0_4 = arith.constant 0 : index
    %11 = vector.load %arg2[%c0_3, %c0_4] : memref<1x32xf32, #tpu.memory_space<vmem>>, vector<1x32xf32>
    %12 = vector.broadcast %11 : vector<1x32xf32> to vector<8x32xf32>
    %13 = arith.mulf %10, %12 : vector<8x32xf32>
    %c0_5 = arith.constant 0 : index
    %c0_6 = arith.constant 0 : index
    %14 = vector.load %arg3[%c0_5, %c0_6] : memref<8x32xf32, #tpu.memory_space<vmem>>, vector<8x32xf32>
    tpu.vector_store %arg3[%c0_5, %c0_6], %13 {strides = array<i32>} : memref<8x32xf32, #tpu.memory_space<vmem>>, vector<8x32xf32>,
    return
  }
  func.func @transform_0(%arg0: i32) -> (i32, i32) {
    %c0_i32 = arith.constant 0 : i32
    %c0_i32_0 = arith.constant 0 : i32
    return %arg0, %c0_i32 : i32, i32
  }
  func.func @transform_1(%arg0: i32) -> (i32, i32) {
    %c0_i32 = arith.constant 0 : i32
    %c0_i32_0 = arith.constant 0 : i32
    %c0_i32_1 = arith.constant 0 : i32
    return %c0_i32, %c0_i32_0 : i32, i32
  }
  func.func @transform_2(%arg0: i32) -> (i32, i32) {
    %c0_i32 = arith.constant 0 : i32
    %c0_i32_0 = arith.constant 0 : i32
    return %arg0, %c0_i32 : i32, i32
  }
}

</mosaic_0001>

<bundles_post_ra>
// kernel: tpu_custom_call.1
= control target key start
LH: loop header
LB: loop body
LE: loop exit
PB: predicated region body
PF: predicated region fallthrough
CT: control target
= control target key end

     0   :  { %7 = vsyncpa [#allocation3], 0  ;;  %s604_s0 = inlined_call_operand.hbm [shape: f32[16,32], index: 0, kind: input, shape index: {}]   ;;  %s605_s1 = inlined_call_operand.vmem [shape: f32[1,32], index: 1, kind: input, shape index: {}]   ;;  %s606_s2 = inlined_call_operand.hbm [shape: f32[16,32], index: 2, kind: output, shape index: {}]  }
   0x1   :  { %9 = vsyncpa [#allocation3 + $0x1], 0 }
   0x2   :  { %10 = vsyncpa [#allocation4], 0 }
   0x3   :  { %12 = vsyncpa [#allocation4 + $0x1], 0  ;;  %s438_s9 = smov 0   ;;  %s440_s10 = smov 0  }
   0x4   :  { %s442_s11 = smov 0   ;;  %s444_s12 = smov 0  }
   0x5 LB: > { %s459_s13 = sadd.s32 4294967295, %s419_s12   ;;  %s262_s14 = sadd.s32 4294967294, %s419_s12   ;;  %s419_s12 = sphi %s444_s12, %s621_s12   ;;  %s415_s11 = sphi %s442_s11, %s620_s11   ;;  %s411_s10 = sphi %s440_s10, %s619_s10   ;;  %s407_s9 = sphi %s438_s9, %s618_s9  }
   0x6   : > { %s463_s15 = sadd.s32 1, %s419_s12   ;;  %s25_s16 = sadd.s32 1, %s415_s11 }
   0x7   : > { %s22_s17 = ssub.s32 %s419_s12, %s463_s15  ;;  %p32_p0 = scmp.ne.s32.totalorder %s415_s11, %s411_s10 }
   0x8   : > { %p23_p1 = scmp.eq.s32.totalorder %s22_s17, 0  ;;  %p33_p2 = scmp.eq.s32.totalorder %s419_s12, 0 }
   0x9   : > { %p38_p3 = scmp.ne.s32.totalorder %s411_s10, %s407_s9  ;;  %p39_p4 = scmp.eq.s32.totalorder %s459_s13, 0 }
   0xa   : > { %s475_s18 = scalar_select %p23_p1, %s415_s11, %s25_s16  }
   0xb   : > { %p477_p5 = por %p33_p2, %p32_p0  ;;  %p481_p6 = por %p39_p4, %p38_p3 }
   0xc   : > { %p83_p7 = scmp.eq.s32.totalorder %s459_s13, 1  ;;  %p89_p8 = scmp.eq.s32.totalorder %s262_s14, 1 }
   0xd   : > { %p287_p10 = scmp.lt.s32.totalorder %s419_s12, 2  ;;  %s112_s23 = sand.u32 1, %s415_s11  }
   0xe   : > { %p488_p11 = por %p83_p7, %p32_p0  ;;  %p492_p12 = por %p89_p8, %p38_p3 }
   0xf   : > { %s266_s24 = sshll.u32 %s419_s12, 7  ;;  %s265_s25 = sshll.u32 %s112_s23, 3 }
  0x10   : > { %s610_s21 = scalar_select %p488_p11, 1, 0 }
  0x11   : > { %s611_s22 = scalar_select %p492_p12, 1, 0 }
  0x12   : > { %s501_s28 = scalar_lea.hbm %s604_s0, %s266_s24  ;;  %s116_s29 = scalar_lea.vmem [#allocation2], %s265_s25 }
  0x13   : > { %s123_s30 = sshll.u32 %s116_s29, 4  ;;  %p505_p13 = pnand %p287_p10, %p477_p5  ;;  %s509_s30 = int_to_ptr.vmem [resolvable:$true] %s123_s30 }
  0x14   : > { %s113_s4 = scalar_lea.sflag [#allocation3], %s112_s23  ;;  %s323_s5 = scalar_lea.hbm %s501_s28, 128 }
  0x15   : > { %p324_p2 = scmp.ne.s32.totalorder %s501_s28, %s323_s5  ;;  %p325_p3 = pneg %p505_p13 }
  0x16   : > { %s328_s8 = scalar_lea.hbm %s604_s0, 256  ;;  %p329_p5 = scmp.lt.u32.totalorder %s501_s28, %s604_s0 }
  0x17   : > { %p326_p4 = pnand %p325_p3, %p324_p2  ;;  %p330_p8 = scmp.lt.u32.totalorder %s328_s8, %s323_s5 }
  0x18   : > { %p332_p9 = scmp.lt.u32.totalorder %s323_s5, %s501_s28 }
  0x19   : > { %p327_p7 = pneg %p326_p4  ;;  %p331_p10 = por %p330_p8, %p329_p5 }
  0x1b   : > { %p333_p0 = por %p332_p9, %p331_p10 }
  0x1d   : > { %p334_p1 = pnand %p333_p0, %p327_p7 }
  0x1f   : > { %337 = shalt.err (!%p334_p1)
}
  0x20   : > { %s338_s17 = scalar_lea.vmem %s509_s30, 128  ;;  %s421_s19 = smov [#allocation2]  }
  0x21   : > { %p339_p2 = scmp.ne.s32.totalorder %s509_s30, %s338_s17  ;;  %s343_s23 = sshll.u32 %s421_s19, 4  ;;  %s344_s23 = int_to_ptr.vmem [resolvable:$false] %s343_s23 }
  0x22   : > { %s345_s24 = scalar_lea.vmem %s344_s23, 256  ;;  %p346_p11 = scmp.lt.s32.totalorder %s509_s30, %s344_s23 }
  0x23   : > { %p341_p4 = pnand %p339_p2, %p325_p3  ;;  %p347_p5 = scmp.lt.s32.totalorder %s345_s24, %s338_s17 }
  0x25   : > { %p342_p12 = pneg %p341_p4  ;;  %p348_p8 = por %p347_p5, %p346_p11 }
  0x27   : > { %p349_p9 = pnand %p348_p8, %p342_p12 }
  0x29   : > { %352 = shalt.err (!%p349_p9)
}
  0x2a   : > { %282 = dma.hbm_to_vmem [thread:$0]  (!%p505_p13), %s501_s28, 128, %s509_s30, %s113_s4  }
  0x2b   : > { %p613_p0 = scmp.lt.s32.totalorder %s419_s12, 3  ;;  %p614_p1 = scmp.ge.s32.totalorder %s419_s12, 1 }
  0x2d   : > { %p129_p3 = pnand %p614_p1, %p613_p0 }
  0x2e   : > { %s543_s25 = sand.u32 (!%p129_p3), 1, %s411_s10  }
  0x2f   : > { %132 = sbr.rel (%p129_p3) target bundleno = 234 (0xea), region = 28  ;;  %s268_s26 = sshll.u32 (!%p129_p3), %s543_s25, 3 }
  0x30   : > { %s135_s27 = scalar_lea.sflag (!%p129_p3), [#allocation3], %s543_s25  ;;  %s138_s29 = scalar_lea.vmem (!%p129_p3), [#allocation2], %s268_s26 }
  0x36   : > { %398 = dma.done.wait (%p481_p6), %s135_s27, 128  }
  0x37   : > { %400 = vsyncadd (%p481_p6), %s135_s27, 4294967168  ;;  %v159_v0 = vld [vmem:[%s138_s29] sm:$0xff]  ;;  %vm161_vm0 = vcmask 261120   ;;  %s272_s20 = sshll.u32 %s459_s13, 7  ;;  %s158_s3 = scalar_lea.vmem [#allocation5], %s268_s26 }
  0x38   : > { %v160_v1 = vmul.f32 %v159_v0, %v159_v0  ;;  %v270_v7 = vld [vmem:[%s605_s1] ss:$0 sm:$0xff]  ;;  %s192_s4 = sshll.u32 %s158_s3, 4  ;;  %s559_s7 = scalar_lea.hbm %s606_s2, %s272_s20  ;;  %s561_s4 = int_to_ptr.vmem [resolvable:$true] %s192_s4 }
  0x39   : > { %s179_s8 = scalar_lea.sflag [#allocation4], %s543_s25  ;;  %s353_s14 = scalar_lea.vmem %s561_s4, 128 }
  0x3a   : > { %v162_v2 = vsel %vm161_vm0, %v160_v1, 0.0  ;;  %p354_p6 = scmp.ne.s32.totalorder %s561_s4, %s353_s14  ;;  %p615_p11 = scmp.ne.s32.totalorder %s610_s21, 0 }
  0x3b   : > { %163 = vadd.xlane.f32.xlu0 %v162_v2  ;;  %s422_s13 = smov [#allocation5]  }
  0x3c   : > { %p355_p12 = pnand %p354_p6, %p615_p11  ;;  %s357_s16 = sshll.u32 %s422_s13, 4  ;;  %s358_s16 = int_to_ptr.vmem [resolvable:$false] %s357_s16 }
  0x3d   : > { %s359_s17 = scalar_lea.vmem %s358_s16, 256  ;;  %p360_p7 = scmp.lt.s32.totalorder %s561_s4, %s358_s16 }
  0x3e   : > { %p356_p13 = pneg %p355_p12  ;;  %p361_p10 = scmp.lt.s32.totalorder %s359_s17, %s353_s14 }
  0x40   : > { %p362_p2 = por %p361_p10, %p360_p7 }
  0x42   : > { %p363_p4 = pnand %p362_p2, %p356_p13 }
  0xc8   : > { %v164_v3 = vpop.xlane.xlu0 %163 }
  0xc9   : > { %v165_v4 = vmul.f32 0.03125, %v164_v3 }
  0xcb   : > { %v166_v5 = vadd.f32 1e-06, %v165_v4 }
  0xcd   : > { %321 = vrsqrt.f32 %v166_v5 }
  0xd7   : > { %v322_v6 = vpop.eup %321 }
  0xd8   : > { %v168_v8 = vmul.f32 %v322_v6, %v159_v0 }
  0xda   : > { %v176_v9 = vmul.f32 %v270_v7, %v168_v8 }
  0xdc   : > { %177 = vst.msk [vmem:[%s158_s3] sm:$0xff] %vm161_vm0, %v176_v9 }
  0xdd   : > { %366 = shalt.err (!%p363_p4)
}
  0xde   : > { %s367_s19 = scalar_lea.hbm %s559_s7, 128  ;;  %s371_s25 = scalar_lea.hbm %s606_s2, 256 }
  0xdf   : > { %p368_p5 = scmp.ne.s32.totalorder %s559_s7, %s367_s19  ;;  %p372_p0 = scmp.lt.u32.totalorder %s559_s7, %s606_s2 }
  0xe0   : > { %p373_p1 = scmp.lt.u32.totalorder %s371_s25, %s367_s19  ;;  %p375_p6 = scmp.lt.u32.totalorder %s367_s19, %s559_s7 }
  0xe1   : > { %p369_p8 = pnand %p368_p5, %p615_p11 }
  0xe2   : > { %p374_p3 = por %p373_p1, %p372_p0 }
  0xe3   : > { %p370_p9 = pneg %p369_p8 }
  0xe4   : > { %p376_p12 = por %p375_p6, %p374_p3 }
  0xe6   : > { %p377_p13 = pnand %p376_p12, %p370_p9 }
  0xe8   : > { %380 = shalt.err (!%p377_p13)
}
  0xe9   : > { %277 = dma.vmem_to_hbm [thread:$0]  (%p615_p11), %s561_s4, 128, %s559_s7, %s179_s8  }
  0xea PF: > { %s204_s29 = sand.u32 1, %s407_s9   ;;  %p616_p7 = scmp.ne.s32.totalorder %s611_s22, 0 }
  0xeb   : > { %p617_p10 = scmp.ge.s32.totalorder %s419_s12, 2  ;;  %s205_s28 = scalar_lea.sflag [#allocation4], %s204_s29 }
  0xed   : > { %p284_p2 = pnand %p617_p10, %p616_p7 }
  0xef   : > { %402 = dma.done.wait (!%p284_p2), %s205_s28, 128  }
  0xf0   : > { %404 = vsyncadd (!%p284_p2), %s205_s28, 4294967168  ;;  %p15_p4 = scmp.ge.s32.totalorder %s463_s15, 4   ;;  %s618_s9 = smov %s411_s10 }
  0xf1   : > { %s619_s10 = smov %s415_s11  ;;  %s620_s11 = smov %s475_s18 }
  0xf2   : > { %s621_s12 = smov %s463_s15  ;;  %17 = sbr.rel (!%p15_p4) target bundleno = 5 (0x5), region = 73 }
  0xf9   :  { %210 = vsyncpa [#allocation3], 1 }
  0xfa   :  { %212 = vsyncpa [#allocation3 + $0x1], 1 }
  0xfb   :  { %213 = vsyncpa [#allocation4], 1 }
  0xfc   :  { %215 = vsyncpa [#allocation4 + $0x1], 1 }

</bundles_post_ra>
